<compile_context>
chip_gen: v6e
topology: v6e:2x2x1
jax: 0.10.0
libtpu: 0.0.40
codegen_flags: <defaults>
</compile_context>

<pallas_src>
import functools

import jax
import jax.numpy as jnp
from jax.experimental import pallas as pl
from jax.experimental.pallas import tpu as pltpu


def _actor_kernel(state_ref, w1_ref, w2_ref, w3_ref, b_ref, out_ref, *,
                  action_dim, max_action):
    # Hoist bias reads once (f32, (1, H) views -> implicit broadcast later).
    b1 = b_ref[0:1, :]                               # (1, H)
    b2 = b_ref[1:2, :]                               # (1, H)
    b3 = b_ref[2:3, :][:, :action_dim]               # (1, A)

    x = state_ref[...]                               # (TB, S) bf16

    # Layer 1 + ReLU: bf16 operands, f32 accumulate on the MXU.
    h1 = jnp.dot(x, w1_ref[...], preferred_element_type=jnp.float32)
    h1 = jnp.maximum(h1 + b1, 0.0)                   # (TB, H) f32

    # Layer 2 + ReLU.
    h2 = jnp.dot(h1.astype(w2_ref.dtype), w2_ref[...],
                 preferred_element_type=jnp.float32)
    h2 = jnp.maximum(h2 + b2, 0.0)                   # (TB, H) f32

    # Layer 3: output width A << 128 -> skip the degenerate MXU matmul and do a
    # VPU multiply + XLU lane reduction per output column (f32 throughout).
    cols = [jnp.sum(h2 * w3_ref[a:a + 1, :], axis=-1, keepdims=True)
            for a in range(action_dim)]              # A x (TB, 1)
    pre = jnp.concatenate(cols, axis=-1) + b3        # (TB, A)

    out_ref[...] = (max_action * jnp.tanh(pre)).astype(out_ref.dtype)


def actor_forward(state, params, max_action, *, block_b=256,
                  compute_dtype=jnp.bfloat16):
    w1, b1, w2, b2, w3, b3 = params                  # w1 (S,H), w2 (H,H), w3 (A,H)
    S, H = w1.shape
    A = w3.shape[0]
    B = state.shape[0]

    # bf16 inputs for the MXU fast path; biases / final layer stay f32.
    state_c = state.astype(compute_dtype)
    w1_c = w1.astype(compute_dtype)
    w2_c = w2.astype(compute_dtype)
    w3_f = w3.astype(jnp.float32)

    # Pack the three biases into one (3, H) array (b3 zero-padded to H).
    biases = jnp.zeros((3, H), jnp.float32)
    biases = biases.at[0, :].set(b1.astype(jnp.float32))
    biases = biases.at[1, :].set(b2.astype(jnp.float32))
    biases = biases.at[2, :A].set(b3.astype(jnp.float32))

    # Batch tile: whole batch if small, otherwise block_b rows (multiple of 8).
    tb = B if B <= block_b else block_b
    grid = (pl.cdiv(B, tb),)

    kernel = functools.partial(_actor_kernel, action_dim=A,
                               max_action=float(max_action))

    return pl.pallas_call(
        kernel,
        out_shape=jax.ShapeDtypeStruct((B, A), jnp.float32),
        grid_spec=pltpu.PrefetchScalarGridSpec(
            num_scalar_prefetch=0,
            grid=grid,
            in_specs=[
                pl.BlockSpec((tb, S), lambda i: (i, 0)),   # state: streamed
                pl.BlockSpec((S, H), lambda i: (0, 0)),    # w1: VMEM-resident
                pl.BlockSpec((H, H), lambda i: (0, 0)),    # w2: VMEM-resident
                pl.BlockSpec((A, H), lambda i: (0, 0)),    # w3: VMEM-resident
                pl.BlockSpec((3, H), lambda i: (0, 0)),    # packed biases
            ],
            out_specs=pl.BlockSpec((tb, A), lambda i: (i, 0)),
        ),
        compiler_params=pltpu.CompilerParams(
            dimension_semantics=("parallel",)),
    )(state_c, w1_c, w2_c, w3_f, biases)


def init_actor_params(key, state_dim, action_dim, hidden_dim=128):
    # PyTorch nn.Linear default init: U(-1/sqrt(fan_in), 1/sqrt(fan_in)).
    def linear(key, fan_in, fan_out):
        kw, kb = jax.random.split(key)
        bound = 1.0 / float(fan_in) ** 0.5
        w = jax.random.uniform(kw, (fan_in, fan_out), jnp.float32,
                               -bound, bound)
        b = jax.random.uniform(kb, (fan_out,), jnp.float32, -bound, bound)
        return w, b

    k1, k2, k3 = jax.random.split(key, 3)
    w1, b1 = linear(k1, state_dim, hidden_dim)       # (S, H)
    w2, b2 = linear(k2, hidden_dim, hidden_dim)      # (H, H)
    w3t, b3 = linear(k3, hidden_dim, action_dim)     # (H, A)
    w3 = w3t.T                                       # (A, H): one row per action
    return (w1, b1, w2, b2, w3, b3)


def actor_reference(state, params, max_action):
    w1, b1, w2, b2, w3, b3 = params
    h = jnp.maximum(state @ w1 + b1, 0.0)
    h = jnp.maximum(h @ w2 + b2, 0.0)
    return max_action * jnp.tanh(h @ w3.T + b3)


if __name__ == "__main__":
    key = jax.random.PRNGKey(0)
    k_params, k_state = jax.random.split(key)

    batch, state_dim, action_dim, hidden_dim = 8, 16, 4, 128
    max_action = 2.0

    params = init_actor_params(k_params, state_dim, action_dim, hidden_dim)
    state = jax.random.normal(k_state, (batch, state_dim), jnp.float32)

    out = actor_forward(state, params, max_action)
    out = jax.block_until_ready(out)

    ref = actor_reference(state, params, max_action)
    assert out.shape == (batch, action_dim)
    # bf16 MXU inputs with f32 accumulation -> tolerance loosened vs pure f32.
    assert jnp.allclose(out, ref, atol=1e-2, rtol=1e-2), \
        float(jnp.max(jnp.abs(out - ref)))

    print("KERNEL_OK")
</pallas_src>

<mosaic_0001>
module attributes {stable_mosaic.version = 11 : i64} {
  func.func @_actor_kernel(%arg0: i32, %arg1: memref<8x16xbf16, #tpu.memory_space<vmem>>, %arg2: memref<16x128xbf16, #tpu.memory_space<vmem>>, %arg3: memref<128x128xbf16, #tpu.memory_space<vmem>>, %arg4: memref<4x128xf32, #tpu.memory_space<vmem>>, %arg5: memref<3x128xf32, #tpu.memory_space<vmem>>, %arg6: memref<8x4xf32, #tpu.memory_space<vmem>>) attributes {dimension_semantics = [#tpu.dimension_semantics<parallel>], iteration_bounds = array<i64: 1>, scalar_prefetch = 0 : i64, scratch_operands = 0 : i64, tpu.core_type = #tpu.core_type<tc>, window_params = [{transform_indices = @transform_0, window_bounds = array<i64: 8, 16>}, {pipeline_mode = #tpu.pipeline_mode<synchronous>, transform_indices = @transform_1, window_bounds = array<i64: 16, 128>}, {pipeline_mode = #tpu.pipeline_mode<synchronous>, transform_indices = @transform_2, window_bounds = array<i64: 128, 128>}, {pipeline_mode = #tpu.pipeline_mode<synchronous>, transform_indices = @transform_3, window_bounds = array<i64: 4, 128>}, {pipeline_mode = #tpu.pipeline_mode<synchronous>, transform_indices = @transform_4, window_bounds = array<i64: 3, 128>}, {transform_indices = @transform_5, window_bounds = array<i64: 8, 4>}]} {
    %c0 = arith.constant 0 : index
    %c0_0 = arith.constant 0 : index
    %0 = vector.load %arg5[%c0, %c0_0] : memref<3x128xf32, #tpu.memory_space<vmem>>, vector<1x128xf32>
    %c1 = arith.constant 1 : index
    %c0_1 = arith.constant 0 : index
    %1 = vector.load %arg5[%c1, %c0_1] : memref<3x128xf32, #tpu.memory_space<vmem>>, vector<1x128xf32>
    %c2 = arith.constant 2 : index
    %c0_2 = arith.constant 0 : index
    %2 = vector.load %arg5[%c2, %c0_2] : memref<3x128xf32, #tpu.memory_space<vmem>>, vector<1x128xf32>
    %3 = vector.extract_strided_slice %2 {offsets = [0, 0], sizes = [1, 4], strides = [1, 1]} : vector<1x128xf32> to vector<1x4xf32>
    %c0_3 = arith.constant 0 : index
    %c0_4 = arith.constant 0 : index
    %4 = vector.load %arg1[%c0_3, %c0_4] : memref<8x16xbf16, #tpu.memory_space<vmem>>, vector<8x16xbf16>
    %c0_5 = arith.constant 0 : index
    %c0_6 = arith.constant 0 : index
    %5 = vector.load %arg2[%c0_5, %c0_6] : memref<16x128xbf16, #tpu.memory_space<vmem>>, vector<16x128xbf16>
    %cst = arith.constant dense<0.000000e+00> : vector<8x128xf32>
    %6 = tpu.matmul %4, %5, %cst {dimension_numbers = #tpu.dot_dimension_numbers<[1], [0], [0], [1], [0, 0, 1, 1], [], []>} : vector<8x16xbf16>, vector<16x128xbf16>, vector<8x128xf32> -> vector<8x128xf32>
    %7 = vector.broadcast %0 : vector<1x128xf32> to vector<8x128xf32>
    %8 = arith.addf %6, %7 : vector<8x128xf32>
    %cst_7 = arith.constant 0.000000e+00 : f32
    %9 = vector.broadcast %cst_7 : f32 to vector<8x128xf32>
    %10 = arith.maximumf %8, %9 : vector<8x128xf32>
    %11 = arith.truncf %10 : vector<8x128xf32> to vector<8x128xbf16>
    %c0_8 = arith.constant 0 : index
    %c0_9 = arith.constant 0 : index
    %12 = vector.load %arg3[%c0_8, %c0_9] : memref<128x128xbf16, #tpu.memory_space<vmem>>, vector<128x128xbf16>
    %cst_10 = arith.constant dense<0.000000e+00> : vector<8x128xf32>
    %13 = tpu.matmul %11, %12, %cst_10 {dimension_numbers = #tpu.dot_dimension_numbers<[1], [0], [0], [1], [0, 0, 1, 1], [], []>} : vector<8x128xbf16>, vector<128x128xbf16>, vector<8x128xf32> -> vector<8x128xf32>
    %14 = vector.broadcast %1 : vector<1x128xf32> to vector<8x128xf32>
    %15 = arith.addf %13, %14 : vector<8x128xf32>
    %cst_11 = arith.constant 0.000000e+00 : f32
    %16 = vector.broadcast %cst_11 : f32 to vector<8x128xf32>
    %17 = arith.maximumf %15, %16 : vector<8x128xf32>
    %c0_12 = arith.constant 0 : index
    %c0_13 = arith.constant 0 : index
    %18 = vector.load %arg4[%c0_12, %c0_13] : memref<4x128xf32, #tpu.memory_space<vmem>>, vector<1x128xf32>
    %19 = vector.broadcast %18 : vector<1x128xf32> to vector<8x128xf32>
    %20 = arith.mulf %17, %19 : vector<8x128xf32>
    %cst_14 = arith.constant dense<0.000000e+00> : vector<8xf32>
    %21 = vector.multi_reduction <add>, %20, %cst_14 [1] : vector<8x128xf32> to vector<8xf32>
    %22 = vector.shape_cast %21 : vector<8xf32> to vector<8x1xf32>
    %c1_15 = arith.constant 1 : index
    %c0_16 = arith.constant 0 : index
    %23 = vector.load %arg4[%c1_15, %c0_16] : memref<4x128xf32, #tpu.memory_space<vmem>>, vector<1x128xf32>
    %24 = vector.broadcast %23 : vector<1x128xf32> to vector<8x128xf32>
    %25 = arith.mulf %17, %24 : vector<8x128xf32>
    %cst_17 = arith.constant dense<0.000000e+00> : vector<8xf32>
    %26 = vector.multi_reduction <add>, %25, %cst_17 [1] : vector<8x128xf32> to vector<8xf32>
    %27 = vector.shape_cast %26 : vector<8xf32> to vector<8x1xf32>
    %c2_18 = arith.constant 2 : index
    %c0_19 = arith.constant 0 : index
    %28 = vector.load %arg4[%c2_18, %c0_19] : memref<4x128xf32, #tpu.memory_space<vmem>>, vector<1x128xf32>
    %29 = vector.broadcast %28 : vector<1x128xf32> to vector<8x128xf32>
    %30 = arith.mulf %17, %29 : vector<8x128xf32>
    %cst_20 = arith.constant dense<0.000000e+00> : vector<8xf32>
    %31 = vector.multi_reduction <add>, %30, %cst_20 [1] : vector<8x128xf32> to vector<8xf32>
    %32 = vector.shape_cast %31 : vector<8xf32> to vector<8x1xf32>
    %c3 = arith.constant 3 : index
    %c0_21 = arith.constant 0 : index
    %33 = vector.load %arg4[%c3, %c0_21] : memref<4x128xf32, #tpu.memory_space<vmem>>, vector<1x128xf32>
    %34 = vector.broadcast %33 : vector<1x128xf32> to vector<8x128xf32>
    %35 = arith.mulf %17, %34 : vector<8x128xf32>
    %cst_22 = arith.constant dense<0.000000e+00> : vector<8xf32>
    %36 = vector.multi_reduction <add>, %35, %cst_22 [1] : vector<8x128xf32> to vector<8xf32>
    %37 = vector.shape_cast %36 : vector<8xf32> to vector<8x1xf32>
    %38 = tpu.concatenate %22, %27, %32, %37 in 1 : vector<8x1xf32>, vector<8x1xf32>, vector<8x1xf32>, vector<8x1xf32> -> vector<8x4xf32>
    %39 = vector.broadcast %3 : vector<1x4xf32> to vector<8x4xf32>
    %40 = arith.addf %38, %39 : vector<8x4xf32>
    %41 = math.tanh %40 : vector<8x4xf32>
    %cst_23 = arith.constant 2.000000e+00 : f32
    %42 = vector.broadcast %cst_23 : f32 to vector<8x4xf32>
    %43 = arith.mulf %42, %41 : vector<8x4xf32>
    %c0_24 = arith.constant 0 : index
    %c0_25 = arith.constant 0 : index
    %44 = vector.load %arg6[%c0_24, %c0_25] : memref<8x4xf32, #tpu.memory_space<vmem>>, vector<8x4xf32>
    tpu.vector_store %arg6[%c0_24, %c0_25], %43 {strides = array<i32>} : memref<8x4xf32, #tpu.memory_space<vmem>>, vector<8x4xf32>,
    return
  }
  func.func @transform_0(%arg0: i32) -> (i32, i32) {
    %c0_i32 = arith.constant 0 : i32
    %c0_i32_0 = arith.constant 0 : i32
    return %arg0, %c0_i32 : i32, i32
  }
  func.func @transform_1(%arg0: i32) -> (i32, i32) {
    %c0_i32 = arith.constant 0 : i32
    %c0_i32_0 = arith.constant 0 : i32
    %c0_i32_1 = arith.constant 0 : i32
    return %c0_i32, %c0_i32_0 : i32, i32
  }
  func.func @transform_2(%arg0: i32) -> (i32, i32) {
    %c0_i32 = arith.constant 0 : i32
    %c0_i32_0 = arith.constant 0 : i32
    %c0_i32_1 = arith.constant 0 : i32
    return %c0_i32, %c0_i32_0 : i32, i32
  }
  func.func @transform_3(%arg0: i32) -> (i32, i32) {
    %c0_i32 = arith.constant 0 : i32
    %c0_i32_0 = arith.constant 0 : i32
    %c0_i32_1 = arith.constant 0 : i32
    return %c0_i32, %c0_i32_0 : i32, i32
  }
  func.func @transform_4(%arg0: i32) -> (i32, i32) {
    %c0_i32 = arith.constant 0 : i32
    %c0_i32_0 = arith.constant 0 : i32
    %c0_i32_1 = arith.constant 0 : i32
    return %c0_i32, %c0_i32_0 : i32, i32
  }
  func.func @transform_5(%arg0: i32) -> (i32, i32) {
    %c0_i32 = arith.constant 0 : i32
    %c0_i32_0 = arith.constant 0 : i32
    return %arg0, %c0_i32 : i32, i32
  }
}

</mosaic_0001>

<bundles_post_ra>
// kernel: tpu_custom_call.1
= control target key start
LH: loop header
LB: loop body
LE: loop exit
PB: predicated region body
PF: predicated region fallthrough
CT: control target
= control target key end

     0   :  { %10 = vsyncpa [#allocation3], 0  ;;  %s521_s0 = inlined_call_operand.hbm [shape: bf16[8,16], index: 0, kind: input, shape index: {}]   ;;  %s522_s1 = inlined_call_operand.hbm [shape: bf16[16,128], index: 1, kind: input, shape index: {}]   ;;  %s523_s2 = inlined_call_operand.hbm [shape: bf16[128,128], index: 2, kind: input, shape index: {}]   ;;  %s524_s3 = inlined_call_operand.vmem [shape: f32[4,128], index: 3, kind: input, shape index: {}]   ;;  %s525_s4 = inlined_call_operand.hbm [shape: f32[3,128], index: 4, kind: input, shape index: {}]   ;;  %s526_s5 = inlined_call_operand.vmem [shape: f32[8,4], index: 5, kind: output, shape index: {}]  }
   0x1   :  { %11 = vsyncpa [#allocation5], 0 }
   0x2   :  { %12 = vsyncpa [#allocation8], 0  ;;  %s456_s18 = smov [#allocation4]  }
   0x3   :  { %s28_s19 = sshll.u32 %s456_s18, 4  ;;  %s29_s19 = int_to_ptr.vmem [resolvable:$true] %s28_s19 }
   0x4   :  { %s378_s20 = scalar_lea.vmem %s29_s19, 128  ;;  %p383_p1 = scmp.lt.s32.totalorder %s29_s19, %s29_s19 }
   0x5   :  { %p379_p0 = scmp.ne.s32.totalorder %s29_s19, %s378_s20  ;;  %p384_p2 = scmp.lt.s32.totalorder %s378_s20, %s378_s20 }
   0x7   :  { %p385_p3 = por %p384_p2, %p383_p1 }
   0x9   :  { %p386_p4 = pnand %p385_p3, %p379_p0 }
   0xb   :  { %389 = shalt.err (!%p386_p4)
}
   0xc   :  { %s457_s21 = smov 64   ;;  %s458_s22 = smov 4  }
   0xd   :  { %34 = dma.hbm_to_vmem [thread:$0]  %s522_s1, 128, %s29_s19, [#allocation5], %s457_s21, %s457_s21, %s458_s22  }
   0xe   :  { %s459_s25 = smov [#allocation2]   ;;  %s460_s27 = smov [#allocation6]  }
   0xf   :  { %s19_s26 = sshll.u32 %s459_s25, 4  ;;  %s40_s28 = sshll.u32 %s460_s27, 4  ;;  %s20_s26 = int_to_ptr.vmem [resolvable:$true] %s19_s26  ;;  %s41_s28 = int_to_ptr.vmem [resolvable:$true] %s40_s28 }
  0x10   :  { %s398_s29 = scalar_lea.vmem %s20_s26, 64  ;;  %p403_p6 = scmp.lt.s32.totalorder %s20_s26, %s20_s26 }
  0x11   :  { %p399_p5 = scmp.ne.s32.totalorder %s20_s26, %s398_s29  ;;  %p404_p7 = scmp.lt.s32.totalorder %s398_s29, %s398_s29 }
  0x13   :  { %p405_p8 = por %p404_p7, %p403_p6 }
  0x15   :  { %p406_p9 = pnand %p405_p8, %p399_p5 }
  0x17   :  { %409 = shalt.err (!%p406_p9)
}
  0x18   :  { %22 = dma.hbm_to_vmem [thread:$0]  %s521_s0, 64, %s20_s26, [#allocation3]  }
  0x19   :  { %s418_s7 = scalar_lea.vmem %s41_s28, 1024  ;;  %p423_p11 = scmp.lt.s32.totalorder %s41_s28, %s41_s28 }
  0x1a   :  { %p419_p10 = scmp.ne.s32.totalorder %s41_s28, %s418_s7  ;;  %p424_p12 = scmp.lt.s32.totalorder %s418_s7, %s418_s7 }
  0x1c   :  { %p425_p13 = por %p424_p12, %p423_p11 }
  0x1e   :  { %p426_p0 = pnand %p425_p13, %p419_p10 }
  0x20   :  { %429 = shalt.err (!%p426_p0)
}
  0x21   :  { %46 = dma.hbm_to_vmem [thread:$0]  %s523_s2, 1024, %s41_s28, [#allocation5], %s457_s21, %s457_s21, %s458_s22  }
  0x22   :  { %s461_s9 = smov [#allocation7]  }
  0x23   :  { %s55_s10 = sshll.u32 %s461_s9, 4  ;;  %s56_s10 = int_to_ptr.vmem [resolvable:$true] %s55_s10 }
  0x24   :  { %s438_s11 = scalar_lea.vmem %s56_s10, 64  ;;  %p443_p2 = scmp.lt.s32.totalorder %s56_s10, %s56_s10 }
  0x25   :  { %p439_p1 = scmp.ne.s32.totalorder %s56_s10, %s438_s11  ;;  %p444_p3 = scmp.lt.s32.totalorder %s438_s11, %s438_s11 }
  0x27   :  { %p445_p4 = por %p444_p3, %p443_p2 }
  0x29   :  { %p446_p5 = pnand %p445_p4, %p439_p1 }
  0x2b   :  { %449 = shalt.err (!%p446_p5)
}
  0x2c   :  { %58 = dma.hbm_to_vmem [thread:$0]  %s525_s4, 64, %s56_s10, [#allocation8]  }
  0x2d   :  { %450 = dma.done.wait [#allocation3], 64  }
  0x2e   :  { %451 = vsyncadd [#allocation3], 4294967232 }
  0x2f   :  { %452 = dma.done.wait [#allocation5], 1152  }
  0x30   :  { %453 = vsyncadd [#allocation5], 4294966144 }
  0x31   :  { %454 = dma.done.wait [#allocation8], 64  }
  0x32   :  { %455 = vsyncadd [#allocation8], 4294967232  ;;  %v462_v0 = vmov 0.0   ;;  %vm463_vm0 = vmmov 0   ;;  %v359_v1 = vld [vmem:[#allocation4] sm:$0xff]   ;;  %vm88_vm1 = vcmask 130048  }
  0x33   :  { %325 = vmatprep.subr.bf16.mxu0 %v462_v0  ;;  %327 = vmatprep.mubr.msk.bf16.mxu0 %vm463_vm0, %v462_v0  ;;  %v75_v2 = vld [vmem:[#allocation2] sm:$0xf]  ;;  %v360_v3 = vld [vmem:[#allocation6 + $0x38] sm:$0xff]   ;;  %v362_v5 = vld [vmem:[#allocation6 + $0x28] sm:$0xff]   ;;  %vm275_vm2 = vcmask 7168   ;;  %vm277_vm3 = vcmask 15360  }
  0x34   :  { %331 = vmatprep.subr.bf16.mxu1 %v462_v0  ;;  %347 = vmatprep.mubr.msk.bf16.mxu1 %vm463_vm0, %v462_v0  ;;  %v361_v4 = vld [vmem:[#allocation6 + $0x30] sm:$0xff]   ;;  %v363_v6 = vld [vmem:[#allocation6 + $0x20] sm:$0xff]   ;;  %v364_v7 = vld [vmem:[#allocation6 + $0x18] sm:$0xff]   ;;  %vm279_vm4 = vcmask 23552   ;;  %vm288_vm5 = vcmask 31744  }
  0x35   :  { %326 = vmatpush3.bf16.msra.mxu0 %v359_v1  ;;  %332 = vmatpush3.bf16.msra.mxu1 %v360_v3  ;;  %v365_v8 = vld [vmem:[#allocation6 + $0x10] sm:$0xff]   ;;  %v366_v9 = vld [vmem:[#allocation6 + $0x8] sm:$0xff]   ;;  %v367_v10 = vld [vmem:[#allocation6] sm:$0xff]  }
  0x36   :  { %333 = vmatprep.subr.bf16.mxu1 %v462_v0  ;;  %v297_v11 = vld [vmem:[#allocation7] ss:$0 sm:$0xff]  ;;  %v300_v19 = vld [vmem:[#allocation7 + $0x1] ss:$0 sm:$0xff]  ;;  %v311_v23 = vld [vmem:[%s524_s3 + $0x2] ss:$0 sm:$0xff] }
  0x37   :  { %v309_v24 = vld [vmem:[%s524_s3] ss:$0 sm:$0xff]  ;;  %v312_v30 = vld [vmem:[%s524_s3 + $0x3] ss:$0 sm:$0xff]  ;;  %v310_v31 = vld [vmem:[%s524_s3 + $0x1] ss:$0 sm:$0xff] }
  0x38   :  { %328 = vmatmul.mubr.msk.bf16.vlgmr.msra.gmra.mxu0 %vm88_vm1, %v75_v2  ;;  %v313_v37 = vld [vmem:[#allocation7 + $0x2] ss:$0 sm:$0xff] }
  0x39   :  { %334 = vmatpush3.bf16.msra.mxu1 %v361_v4 }
  0x3a   :  { %335 = vmatprep.subr.bf16.mxu1 %v462_v0 }
  0x3d   :  { %336 = vmatpush3.bf16.msra.mxu1 %v362_v5 }
  0x3e   :  { %337 = vmatprep.subr.bf16.mxu1 %v462_v0 }
  0x41   :  { %338 = vmatpush3.bf16.msra.mxu1 %v363_v6 }
  0x42   :  { %339 = vmatprep.subr.bf16.mxu1 %v462_v0 }
  0x45   :  { %340 = vmatpush3.bf16.msra.mxu1 %v364_v7 }
  0x46   :  { %341 = vmatprep.subr.bf16.mxu1 %v462_v0 }
  0x49   :  { %342 = vmatpush3.bf16.msra.mxu1 %v365_v8 }
  0x4a   :  { %343 = vmatprep.subr.bf16.mxu1 %v462_v0 }
  0x4d   :  { %344 = vmatpush3.bf16.msra.mxu1 %v366_v9 }
  0x4e   :  { %345 = vmatprep.subr.bf16.mxu1 %v462_v0 }
  0x51   :  { %346 = vmatpush3.bf16.msra.mxu1 %v367_v10 }
  0xf8   :  { %v126_v12 = vpop.f32.mrf.mxu0 }
  0xf9   :  { %v127_v13 = vadd.f32 %v297_v11, %v126_v12 }
  0xfa   :  { %v329_v14 = vpop.f32.mrf.mxu0 }
  0xfb   :  { %v132_v15 = vmax.f32 %v127_v13, 0.0 }
  0xfc   :  { %v129_v16 = vpop.f32.mrf.mxu0 }
  0xfd   :  { %v133_v17 = vpack.c.bf16 %v132_v15, %v132_v15 }
  0xfe   :  { %v330_v18 = vpop.f32.mrf.mxu0 }
  0xff   :  { %348 = vmatmul.mubr.bf16.vlgmr.msra.gmra.mxu1 %v133_v17 }
 0x1bf   :  { %v236_v20 = vpop.f32.mrf.mxu1 }
 0x1c0   :  { %v237_v21 = vadd.f32 %v300_v19, %v236_v20 }
 0x1c1   :  { %v349_v22 = vpop.f32.mrf.mxu1 }
 0x1c2   :  { %v242_v25 = vmax.f32 %v237_v21, 0.0 }
 0x1c3   :  { %v239_v26 = vpop.f32.mrf.mxu1 }
 0x1c4   :  { %v264_v27 = vmul.f32 %v311_v23, %v242_v25  ;;  %v248_v28 = vmul.f32 %v309_v24, %v242_v25  ;;  %v272_v32 = vmul.f32 %v312_v30, %v242_v25  ;;  %v256_v33 = vmul.f32 %v310_v31, %v242_v25 }
 0x1c5   :  { %v350_v29 = vpop.f32.mrf.mxu1 }
 0x1c6   :  { %265 = vadd.xlane.f32.xlu1 %v264_v27  ;;  %249 = vadd.xlane.f32.xlu0 %v248_v28 }
 0x1ca   :  { %273 = vadd.xlane.f32.xlu1 %v272_v32  ;;  %257 = vadd.xlane.f32.xlu0 %v256_v33 }
 0x24f   :  { %v266_v34 = vpop.xlane.xlu1 %265  ;;  %v250_v35 = vpop.xlane.xlu0 %249 }
 0x253   :  { %v258_v36 = vpop.xlane.xlu0 %257  ;;  %v274_v39 = vpop.xlane.xlu1 %273 }
 0x254   :  { %v276_v38 = vsel %vm275_vm2, %v250_v35, %v258_v36 }
 0x255   :  { %v278_v40 = vsel %vm277_vm3, %v276_v38, %v266_v34 }
 0x256   :  { %v280_v41 = vsel %vm279_vm4, %v278_v40, %v274_v39 }
 0x257   :  { %v285_v42 = vadd.f32 %v313_v37, %v280_v41 }
 0x259   :  { %368 = vtanh.f32 %v285_v42 }
 0x266   :  { %v369_v43 = vpop.eup %368 }
 0x267   :  { %v287_v44 = vmul.f32 2.0, %v369_v43 }
 0x269   :  { %289 = vst.msk [vmem:[%s526_s5] sm:$0xff] %vm288_vm5, %v287_v44 }
 0x26a   :  { %294 = vsyncpa [#allocation3], 1 }
 0x26b   :  { %295 = vsyncpa [#allocation5], 1 }
 0x26c   :  { %296 = vsyncpa [#allocation8], 1 }

</bundles_post_ra>
